<compile_context>
chip_gen: v7x
topology: tpu7x:2x2x1
jax: 0.10.0
libtpu: 0.0.40
codegen_flags: <defaults>
</compile_context>

<pallas_src>
import numpy as np
import jax
import jax.numpy as jnp
from jax import lax
from jax.experimental import pallas as pl
from jax.experimental.pallas import tpu as pltpu

EPS = 1e-5  # PyTorch BatchNorm1d default eps


def _elu(x):
    # nn.ELU(alpha=1.0); min() keeps the unselected exp branch finite.
    return jnp.where(x > 0, x, jnp.exp(jnp.minimum(x, 0.0)) - 1.0)


# --------------------------------------------------------------------------- #
# In-kernel helpers
# --------------------------------------------------------------------------- #
def _conv3_rolled(x, w_ref, not_first, not_last):
    """k=3, stride=1, pad=1 conv along the row axis of a batch-contiguous tile.

    x:          (R, C) bf16 activations (rows ordered (batch, position)).
    w_ref:      (3, C, Cout) weight ref; tap k multiplies x[row + k - 1].
    not_first:  (R, 1) bool, False on the first position of each sequence.
    not_last:   (R, 1) bool, False on the last position of each sequence.
    """
    R = x.shape[0]
    zero = jnp.zeros_like(x)
    xm = jnp.where(not_first, pltpu.roll(x, 1, 0), zero)       # row i -> x[i-1]
    xp = jnp.where(not_last, pltpu.roll(x, R - 1, 0), zero)    # row i -> x[i+1]
    y = jnp.dot(xm, w_ref[0], preferred_element_type=jnp.float32)
    y = y + jnp.dot(x, w_ref[1], preferred_element_type=jnp.float32)
    y = y + jnp.dot(xp, w_ref[2], preferred_element_type=jnp.float32)
    return y


def _make_stats_kernel(stride1, L1, Cin, has_shortcut):
    """Pass 1: conv1 (and 1x1 shortcut conv) per-tile sum / sum-of-squares."""

    def kernel(x_ref, w1_ref, *rest):
        if has_shortcut:
            ws_ref, st_ref = rest
        else:
            (st_ref,) = rest
        x = x_ref[...]                                   # (R, Cin) or (R, 3*Cin) bf16
        if stride1:
            R = x.shape[0]
            l_idx = lax.broadcasted_iota(jnp.int32, (R, 1), 0) % L1
            y1 = _conv3_rolled(x, w1_ref, l_idx != 0, l_idx != (L1 - 1))
        else:
            # stride != 1: im2col slab, single MXU matmul with K = 3*Cin.
            y1 = jnp.dot(x, w1_ref[...], preferred_element_type=jnp.float32)
        rows = [jnp.sum(y1, axis=0, keepdims=True),
                jnp.sum(y1 * y1, axis=0, keepdims=True)]
        if has_shortcut:
            xc = x if stride1 else x[:, :Cin]            # center tap = strided x
            s = jnp.dot(xc, ws_ref[...], preferred_element_type=jnp.float32)
            rows += [jnp.sum(s, axis=0, keepdims=True),
                     jnp.sum(s * s, axis=0, keepdims=True)]
        st_ref[0] = jnp.concatenate(rows, axis=0)        # (nstat, Cout)

    return kernel


def _make_main_kernel(stride1, L1):
    """Pass 2: conv1 -> BN1(affine) -> ELU -> conv2; emit y2 + its stats."""

    def kernel(x_ref, w1_ref, w2_ref, sc1_ref, sh1_ref, y2_ref, st_ref):
        x = x_ref[...]
        R = x.shape[0]
        l_idx = lax.broadcasted_iota(jnp.int32, (R, 1), 0) % L1
        not_first = l_idx != 0
        not_last = l_idx != (L1 - 1)
        if stride1:
            y1 = _conv3_rolled(x, w1_ref, not_first, not_last)
        else:
            y1 = jnp.dot(x, w1_ref[...], preferred_element_type=jnp.float32)
        # Fused BatchNorm affine (single FMA) + ELU, then bf16 for the MXU.
        h1 = _elu(y1 * sc1_ref[...] + sh1_ref[...]).astype(jnp.bfloat16)
        y2 = _conv3_rolled(h1, w2_ref, not_first, not_last)
        y2_ref[...] = y2
        st_ref[0] = jnp.concatenate(
            [jnp.sum(y2, axis=0, keepdims=True),
             jnp.sum(y2 * y2, axis=0, keepdims=True)], axis=0)

    return kernel


def _make_final_kernel(stride1, Cin, has_shortcut):
    """Pass 3: BN2 affine + shortcut (identity or 1x1 conv + BN) + final ELU."""

    def kernel(*refs):
        if has_shortcut:
            y2_ref, x_ref, sc2_ref, sh2_ref, ws_ref, scs_ref, shs_ref, o_ref = refs
        else:
            y2_ref, x_ref, sc2_ref, sh2_ref, o_ref = refs
        y = y2_ref[...] * sc2_ref[...] + sh2_ref[...]
        if has_shortcut:
            x = x_ref[...]
            xc = x if stride1 else x[:, :Cin]
            s = jnp.dot(xc, ws_ref[...], preferred_element_type=jnp.float32)
            s = s * scs_ref[...] + shs_ref[...]
        else:
            s = x_ref[...].astype(jnp.float32)
        o_ref[...] = _elu(y + s)

    return kernel


# --------------------------------------------------------------------------- #
# Wrapper
# --------------------------------------------------------------------------- #
def _pick_batches_per_tile(N, L1, rows_cap):
    """Largest whole-sequence tile (rows divisible by 8) not exceeding rows_cap."""
    cands = [d for d in range(1, N + 1)
             if N % d == 0 and (d * L1) % 8 == 0 and d * L1 <= rows_cap]
    return max(cands) if cands else N


def _tile_spec(arr, rows):
    ndim = arr.ndim
    return pl.BlockSpec((rows,) + tuple(arr.shape[1:]),
                        lambda i, _n=ndim: (i,) + (0,) * (_n - 1))


def _full_spec(arr):
    ndim = arr.ndim
    return pl.BlockSpec(tuple(arr.shape), lambda i, _n=ndim: (0,) * _n)


def _bn_scale_shift(s, ss, count, gamma, beta):
    """Finalize one-pass sum / sumsq into a fused per-channel scale/shift."""
    mean = s / count
    var = jnp.maximum(ss / count - mean * mean, 0.0)
    scale = gamma * lax.rsqrt(var + EPS)
    shift = beta - mean * scale
    return (scale.reshape(1, -1).astype(jnp.float32),
            shift.reshape(1, -1).astype(jnp.float32))


def basic_block_forward(x_ncl, params, stride=1, rows_per_tile_cap=1024):
    """BasicBlock forward.  x_ncl: (N, C_in, L) float32 (PyTorch NCL layout)."""
    N, Cin, L = x_ncl.shape
    Cout = params["w1"].shape[0]
    L1 = (L + 2 - 3) // stride + 1
    M = N * L1
    has_shortcut = (stride != 1) or (Cin != Cout)
    stride1 = (stride == 1)

    # ---- layout glue: channels-last, bf16 matmul operands -------------------
    x_cl = jnp.transpose(x_ncl, (0, 2, 1)).astype(jnp.float32)        # (N, L, Cin)
    w1t = jnp.transpose(params["w1"], (2, 1, 0))                      # (3, Cin, Cout)
    w2k = jnp.transpose(params["w2"], (2, 1, 0)).astype(jnp.bfloat16)  # (3, Cout, Cout)

    if stride1:
        # Single (M, Cin) slab; conv1 taps are built in-kernel via pltpu.roll.
        xslab = x_cl.reshape(M, Cin).astype(jnp.bfloat16)
        w1k = w1t.astype(jnp.bfloat16)                                # (3, Cin, Cout)
    else:
        # Strided conv: im2col into (M, 3*Cin), center tap first so the
        # shortcut's strided input is a lane-aligned prefix slice.
        x_pad = jnp.pad(x_cl, ((0, 0), (1, 1), (0, 0)))
        order = (1, 0, 2)
        taps = jnp.stack(
            [x_pad[:, k:k + stride * (L1 - 1) + 1:stride, :] for k in order],
            axis=2)                                                   # (N, L1, 3, Cin)
        xslab = taps.reshape(M, 3 * Cin).astype(jnp.bfloat16)
        w1k = jnp.concatenate([w1t[k] for k in order],
                              axis=0).astype(jnp.bfloat16)            # (3*Cin, Cout)

    g1, b1 = params["g1"], params["b1"]
    g2, b2 = params["g2"], params["b2"]
    if has_shortcut:
        wsk = jnp.transpose(params["ws"], (2, 1, 0))[0].astype(jnp.bfloat16)  # (Cin, Cout)
        gs, bs = params["gs"], params["bs"]

    nb = _pick_batches_per_tile(N, L1, rows_per_tile_cap)
    nt = N // nb
    R = nb * L1

    cparams = pltpu.CompilerParams(
        dimension_semantics=("parallel",),
        vmem_limit_bytes=32 * 1024 * 1024)

    # ---- pass 1: conv1 (+ shortcut conv) batch statistics --------------------
    nstat = 4 if has_shortcut else 2
    args_a = [xslab, w1k] + ([wsk] if has_shortcut else [])
    stats1 = pl.pallas_call(
        _make_stats_kernel(stride1, L1, Cin, has_shortcut),
        grid=(nt,),
        in_specs=[_tile_spec(xslab, R)] + [_full_spec(a) for a in args_a[1:]],
        out_specs=pl.BlockSpec((1, nstat, Cout), lambda i: (i, 0, 0)),
        out_shape=jax.ShapeDtypeStruct((nt, nstat, Cout), jnp.float32),
        compiler_params=cparams,
    )(*args_a)
    st = jnp.sum(stats1, axis=0)
    sc1, sh1 = _bn_scale_shift(st[0], st[1], M, g1, b1)
    if has_shortcut:
        scs, shs = _bn_scale_shift(st[2], st[3], M, gs, bs)

    # ---- pass 2: BN1 + ELU + conv2; emit y2 and its statistics ---------------
    args_b = [xslab, w1k, w2k, sc1, sh1]
    y2, stats2 = pl.pallas_call(
        _make_main_kernel(stride1, L1),
        grid=(nt,),
        in_specs=[_tile_spec(xslab, R)] + [_full_spec(a) for a in args_b[1:]],
        out_specs=(pl.BlockSpec((R, Cout), lambda i: (i, 0)),
                   pl.BlockSpec((1, 2, Cout), lambda i: (i, 0, 0))),
        out_shape=(jax.ShapeDtypeStruct((M, Cout), jnp.float32),
                   jax.ShapeDtypeStruct((nt, 2, Cout), jnp.float32)),
        compiler_params=cparams,
    )(*args_b)
    st2 = jnp.sum(stats2, axis=0)
    sc2, sh2 = _bn_scale_shift(st2[0], st2[1], M, g2, b2)

    # ---- pass 3: BN2 + shortcut + final ELU ----------------------------------
    args_c = [y2, xslab, sc2, sh2] + ([wsk, scs, shs] if has_shortcut else [])
    out2d = pl.pallas_call(
        _make_final_kernel(stride1, Cin, has_shortcut),
        grid=(nt,),
        in_specs=[_tile_spec(y2, R), _tile_spec(xslab, R)]
                 + [_full_spec(a) for a in args_c[2:]],
        out_specs=pl.BlockSpec((R, Cout), lambda i: (i, 0)),
        out_shape=jax.ShapeDtypeStruct((M, Cout), jnp.float32),
        compiler_params=cparams,
    )(*args_c)

    return jnp.transpose(out2d.reshape(N, L1, Cout), (0, 2, 1))       # (N, Cout, L1)


# --------------------------------------------------------------------------- #
# Parameters / reference
# --------------------------------------------------------------------------- #
def init_params(key, Cin, Cout, with_shortcut):
    keys = jax.random.split(key, 9)
    p = {
        "w1": 0.1 * jax.random.normal(keys[0], (Cout, Cin, 3), jnp.float32),
        "w2": 0.1 * jax.random.normal(keys[1], (Cout, Cout, 3), jnp.float32),
        "g1": 1.0 + 0.1 * jax.random.normal(keys[2], (Cout,), jnp.float32),
        "b1": 0.1 * jax.random.normal(keys[3], (Cout,), jnp.float32),
        "g2": 1.0 + 0.1 * jax.random.normal(keys[4], (Cout,), jnp.float32),
        "b2": 0.1 * jax.random.normal(keys[5], (Cout,), jnp.float32),
    }
    if with_shortcut:
        p["ws"] = 0.1 * jax.random.normal(keys[6], (Cout, Cin, 1), jnp.float32)
        p["gs"] = 1.0 + 0.1 * jax.random.normal(keys[7], (Cout,), jnp.float32)
        p["bs"] = 0.1 * jax.random.normal(keys[8], (Cout,), jnp.float32)
    return p


def _conv1d_ncl(x, w, stride, pad):
    return lax.conv_general_dilated(
        x, w, (stride,), [(pad, pad)],
        dimension_numbers=("NCH", "OIH", "NCH"),
        precision=lax.Precision.HIGHEST)


def _bn_ref(y, g, b):
    mean = jnp.mean(y, axis=(0, 2), keepdims=True)
    var = jnp.mean((y - mean) ** 2, axis=(0, 2), keepdims=True)
    return (y - mean) * (g.reshape(1, -1, 1) * lax.rsqrt(var + EPS)) + b.reshape(1, -1, 1)


def reference(x, params, stride, quantize_matmul_inputs=False):
    """Pure-JAX reference mirroring the PyTorch forward in training mode.

    quantize_matmul_inputs=True models the kernel's numerics contract exactly:
    bf16 conv operands with f32 accumulation (BN / ELU stay in f32).
    """
    q = ((lambda a: a.astype(jnp.bfloat16).astype(jnp.float32))
         if quantize_matmul_inputs else (lambda a: a))
    N, Cin, L = x.shape
    Cout = params["w1"].shape[0]
    has_shortcut = (stride != 1) or (Cin != Cout)
    xq = q(x)
    r = _conv1d_ncl(xq, q(params["w1"]), stride, 1)
    r = _elu(_bn_ref(r, params["g1"], params["b1"]))
    r = _bn_ref(_conv1d_ncl(q(r), q(params["w2"]), 1, 1), params["g2"], params["b2"])
    if has_shortcut:
        s = _bn_ref(_conv1d_ncl(xq, q(params["ws"]), stride, 0),
                    params["gs"], params["bs"])
    else:
        s = xq
    return _elu(r + s)


if __name__ == "__main__":
    key = jax.random.PRNGKey(0)
    kx1, kx2, kp1, kp2 = jax.random.split(key, 4)

    # Case 1 -- block3-like: 68 -> 128 channels, stride 2 (conv shortcut).
    # rows_per_tile_cap=8 forces a 2-tile grid to exercise the tiled /
    # cross-tile statistics path.
    x1 = jax.random.normal(kx1, (2, 68, 16), jnp.float32)   # (N, C, L)
    p1 = init_params(kp1, 68, 128, with_shortcut=True)
    out1 = jax.block_until_ready(
        basic_block_forward(x1, p1, stride=2, rows_per_tile_cap=8))
    np.testing.assert_allclose(
        np.asarray(out1),
        np.asarray(reference(x1, p1, 2, quantize_matmul_inputs=True)),
        rtol=2e-2, atol=2e-2)
    np.testing.assert_allclose(
        np.asarray(out1), np.asarray(reference(x1, p1, 2)),
        rtol=1e-1, atol=1.5e-1)

    # Case 2 -- block1-like: 68 -> 68 channels, stride 1 (identity shortcut),
    # single-tile grid.
    x2 = jax.random.normal(kx2, (2, 68, 16), jnp.float32)
    p2 = init_params(kp2, 68, 68, with_shortcut=False)
    out2 = jax.block_until_ready(basic_block_forward(x2, p2, stride=1))
    np.testing.assert_allclose(
        np.asarray(out2),
        np.asarray(reference(x2, p2, 1, quantize_matmul_inputs=True)),
        rtol=2e-2, atol=2e-2)
    np.testing.assert_allclose(
        np.asarray(out2), np.asarray(reference(x2, p2, 1)),
        rtol=1e-1, atol=1.5e-1)

    print("KERNEL_OK")
</pallas_src>

<mosaic_0001>
module attributes {stable_mosaic.version = 11 : i64} {
  func.func @kernel(%arg0: i32, %arg1: memref<8x204xbf16, #tpu.memory_space<vmem>>, %arg2: memref<204x128xbf16, #tpu.memory_space<vmem>>, %arg3: memref<68x128xbf16, #tpu.memory_space<vmem>>, %arg4: memref<1x4x128xf32, #tpu.memory_space<vmem>>) attributes {dimension_semantics = [#tpu.dimension_semantics<parallel>], iteration_bounds = array<i64: 2>, scalar_prefetch = 0 : i64, scratch_operands = 0 : i64, tpu.core_type = #tpu.core_type<tc>, window_params = [{transform_indices = @transform_0, window_bounds = array<i64: 8, 204>}, {pipeline_mode = #tpu.pipeline_mode<synchronous>, transform_indices = @transform_1, window_bounds = array<i64: 204, 128>}, {pipeline_mode = #tpu.pipeline_mode<synchronous>, transform_indices = @transform_2, window_bounds = array<i64: 68, 128>}, {transform_indices = @transform_3, window_bounds = array<i64: 1, 4, 128>}]} {
    %c0 = arith.constant 0 : index
    %c0_0 = arith.constant 0 : index
    %0 = vector.load %arg1[%c0, %c0_0] : memref<8x204xbf16, #tpu.memory_space<vmem>>, vector<8x204xbf16>
    %c0_1 = arith.constant 0 : index
    %c0_2 = arith.constant 0 : index
    %1 = vector.load %arg2[%c0_1, %c0_2] : memref<204x128xbf16, #tpu.memory_space<vmem>>, vector<204x128xbf16>
    %cst = arith.constant dense<0.000000e+00> : vector<8x128xf32>
    %2 = tpu.matmul %0, %1, %cst {dimension_numbers = #tpu.dot_dimension_numbers<[1], [0], [0], [1], [0, 0, 1, 1], [], []>} : vector<8x204xbf16>, vector<204x128xbf16>, vector<8x128xf32> -> vector<8x128xf32>
    %cst_3 = arith.constant dense<0.000000e+00> : vector<128xf32>
    %3 = vector.multi_reduction <add>, %2, %cst_3 [0] : vector<8x128xf32> to vector<128xf32>
    %4 = vector.shape_cast %3 : vector<128xf32> to vector<1x128xf32>
    %5 = arith.mulf %2, %2 : vector<8x128xf32>
    %cst_4 = arith.constant dense<0.000000e+00> : vector<128xf32>
    %6 = vector.multi_reduction <add>, %5, %cst_4 [0] : vector<8x128xf32> to vector<128xf32>
    %7 = vector.shape_cast %6 : vector<128xf32> to vector<1x128xf32>
    %8 = vector.extract_strided_slice %0 {offsets = [0, 0], sizes = [8, 68], strides = [1, 1]} : vector<8x204xbf16> to vector<8x68xbf16>
    %c0_5 = arith.constant 0 : index
    %c0_6 = arith.constant 0 : index
    %9 = vector.load %arg3[%c0_5, %c0_6] : memref<68x128xbf16, #tpu.memory_space<vmem>>, vector<68x128xbf16>
    %cst_7 = arith.constant dense<0.000000e+00> : vector<8x128xf32>
    %10 = tpu.matmul %8, %9, %cst_7 {dimension_numbers = #tpu.dot_dimension_numbers<[1], [0], [0], [1], [0, 0, 1, 1], [], []>} : vector<8x68xbf16>, vector<68x128xbf16>, vector<8x128xf32> -> vector<8x128xf32>
    %cst_8 = arith.constant dense<0.000000e+00> : vector<128xf32>
    %11 = vector.multi_reduction <add>, %10, %cst_8 [0] : vector<8x128xf32> to vector<128xf32>
    %12 = vector.shape_cast %11 : vector<128xf32> to vector<1x128xf32>
    %13 = arith.mulf %10, %10 : vector<8x128xf32>
    %cst_9 = arith.constant dense<0.000000e+00> : vector<128xf32>
    %14 = vector.multi_reduction <add>, %13, %cst_9 [0] : vector<8x128xf32> to vector<128xf32>
    %15 = vector.shape_cast %14 : vector<128xf32> to vector<1x128xf32>
    %16 = tpu.concatenate %4, %7, %12, %15 in 0 : vector<1x128xf32>, vector<1x128xf32>, vector<1x128xf32>, vector<1x128xf32> -> vector<4x128xf32>
    %c0_10 = arith.constant 0 : index
    %c0_11 = arith.constant 0 : index
    %c0_12 = arith.constant 0 : index
    %17 = vector.load %arg4[%c0_10, %c0_11, %c0_12] : memref<1x4x128xf32, #tpu.memory_space<vmem>>, vector<1x4x128xf32>
    %18 = vector.shape_cast %17 : vector<1x4x128xf32> to vector<4x128xf32>
    %19 = vector.shape_cast %16 : vector<4x128xf32> to vector<1x4x128xf32>
    tpu.vector_store %arg4[%c0_10, %c0_11, %c0_12], %19 {strides = array<i32>} : memref<1x4x128xf32, #tpu.memory_space<vmem>>, vector<1x4x128xf32>,
    return
  }
  func.func @transform_0(%arg0: i32) -> (i32, i32) {
    %c0_i32 = arith.constant 0 : i32
    %c0_i32_0 = arith.constant 0 : i32
    return %arg0, %c0_i32 : i32, i32
  }
  func.func @transform_1(%arg0: i32) -> (i32, i32) {
    %c0_i32 = arith.constant 0 : i32
    %c0_i32_0 = arith.constant 0 : i32
    %c0_i32_1 = arith.constant 0 : i32
    return %c0_i32, %c0_i32_0 : i32, i32
  }
  func.func @transform_2(%arg0: i32) -> (i32, i32) {
    %c0_i32 = arith.constant 0 : i32
    %c0_i32_0 = arith.constant 0 : i32
    %c0_i32_1 = arith.constant 0 : i32
    return %c0_i32, %c0_i32_0 : i32, i32
  }
  func.func @transform_3(%arg0: i32) -> (i32, i32, i32) {
    %c0_i32 = arith.constant 0 : i32
    %c0_i32_0 = arith.constant 0 : i32
    %c0_i32_1 = arith.constant 0 : i32
    return %arg0, %c0_i32, %c0_i32_0 : i32, i32, i32
  }
}

</mosaic_0001>

<bundles_post_ra>
// kernel: tpu_custom_call.1
= control target key start
LH: loop header
LB: loop body
LE: loop exit
PB: predicated region body
PF: predicated region fallthrough
CT: control target
= control target key end

     0   :  { %8 = vsyncpa [#allocation3], 0  ;;  %s1181_s0 = inlined_call_operand.hbm [shape: bf16[16,204], index: 0, kind: input, shape index: {}]   ;;  %s1182_s1 = inlined_call_operand.hbm [shape: bf16[204,128], index: 1, kind: input, shape index: {}]   ;;  %s1183_s2 = inlined_call_operand.hbm [shape: bf16[68,128], index: 2, kind: input, shape index: {}]   ;;  %s1184_s3 = inlined_call_operand.hbm [shape: f32[2,4,128], index: 3, kind: output, shape index: {}]  }
   0x1   :  { %10 = vsyncpa [#allocation3 + $0x1], 0 }
   0x2   :  { %11 = vsyncpa [#allocation6], 0 }
   0x3   :  { %12 = vsyncpa [#allocation4], 0 }
   0x4   :  { %14 = vsyncpa [#allocation4 + $0x1], 0  ;;  %s933_s12 = smov 0   ;;  %s935_s13 = smov 0  }
   0x5   :  { %s937_s14 = smov 0   ;;  %s939_s15 = smov 0  }
   0x6 LB: > { %s954_s16 = sadd.s32 4294967295, %s902_s15   ;;  %s594_s17 = sadd.s32 4294967294, %s902_s15   ;;  %s902_s15 = sphi %s939_s15, %s1204_s15   ;;  %s898_s14 = sphi %s937_s14, %s1203_s14   ;;  %s894_s13 = sphi %s935_s13, %s1202_s13   ;;  %s890_s12 = sphi %s933_s12, %s1201_s12  }
   0x7   : > { %p40_p0 = scmp.ne.s32.totalorder %s894_s13, %s890_s12  ;;  %p1185_p1 = scmp.eq.s32.totalorder %s954_s16, 0 }
   0x8   : > { %p112_p3 = scmp.eq.s32.totalorder %s594_s17, 1  ;;  %p595_p5 = scmp.ge.s32.totalorder %s902_s15, 1 }
   0x9   : > { %p963_p4 = por %p1185_p1, %p40_p0  ;;  %p119_p7 = scmp.lt.s32.totalorder %s902_s15, 3 }
   0xa   : > { %p968_p6 = por %p112_p3, %p40_p0  ;;  %s904_s21 = smov [#allocation5]  }
   0xb   : > { %s1188_s18 = scalar_select %p963_p4, 1, 0 }
   0xc   : > { %s1189_s19 = scalar_select %p968_p6, 1, 0 }
   0xd   : > { %p973_p8 = pnand %p595_p5, %p119_p7  ;;  %s131_s22 = sshll.u32 %s904_s21, 4  ;;  %s977_s22 = int_to_ptr.vmem [resolvable:$true] %s131_s22 }
   0xe   : > { %s905_s24 = smov [#allocation7]   ;;  %s746_s28 = scalar_lea.hbm %s1182_s1, 1664 }
   0xf   : > { %p666_p9 = pneg %p973_p8  ;;  %s144_s25 = sshll.u32 %s905_s24, 4  ;;  %s988_s25 = int_to_ptr.vmem [resolvable:$true] %s144_s25 }
  0x10   : > { %p747_p12 = scmp.ne.s32.totalorder %s1182_s1, %s746_s28  ;;  %p753_p5 = scmp.lt.u32.totalorder %s746_s28, %s1182_s1 }
  0x11   : > { %p984_p11 = pnand %p666_p9, %p1185_p1 }
  0x13   : > { %p748_p13 = pneg %p984_p11 }
  0x15   : > { %p749_p0 = pnand %p748_p13, %p747_p12 }
  0x17   : > { %p750_p3 = pneg %p749_p0 }
  0x19   : > { %p755_p7 = pnand %p753_p5, %p750_p3 }
  0x1b   : > { %758 = shalt.err (!%p755_p7)
}
  0x1c   : > { %s759_s6 = scalar_lea.vmem %s977_s22, 1664  ;;  %p767_p2 = scmp.lt.s32.totalorder %s977_s22, %s977_s22 }
  0x1d   : > { %p760_p9 = scmp.ne.s32.totalorder %s977_s22, %s759_s6  ;;  %p768_p12 = scmp.lt.s32.totalorder %s759_s6, %s759_s6 }
  0x1f   : > { %p762_p10 = pnand %p760_p9, %p748_p13  ;;  %p769_p0 = por %p768_p12, %p767_p2 }
  0x21   : > { %p763_p1 = pneg %p762_p10 }
  0x23   : > { %p770_p6 = pnand %p769_p0, %p763_p1 }
  0x25   : > { %773 = shalt.err (!%p770_p6)
}
  0x26   : > { %s906_s7 = smov 64   ;;  %s907_s8 = smov 4  }
  0x27   : > { %669 = dma.hbm_to_vmem [thread:$0]  (!%p984_p11), %s1182_s1, 1664, %s977_s22, [#allocation6], %s906_s7, %s906_s7, %s907_s8  }
  0x28   : > { %s774_s21 = scalar_lea.hbm %s1183_s2, 576 }
  0x29   : > { %p775_p2 = scmp.ne.s32.totalorder %s1183_s2, %s774_s21  ;;  %p781_p10 = scmp.lt.u32.totalorder %s774_s21, %s1183_s2 }
  0x2b   : > { %p777_p1 = pnand %p775_p2, %p748_p13 }
  0x2d   : > { %p778_p6 = pneg %p777_p1 }
  0x2f   : > { %p783_p3 = pnand %p781_p10, %p778_p6 }
  0x31   : > { %786 = shalt.err (!%p783_p3)
}
  0x32   : > { %s787_s22 = scalar_lea.vmem %s988_s25, 576  ;;  %p795_p12 = scmp.lt.s32.totalorder %s988_s25, %s988_s25 }
  0x33   : > { %p788_p5 = scmp.ne.s32.totalorder %s988_s25, %s787_s22  ;;  %p796_p0 = scmp.lt.s32.totalorder %s787_s22, %s787_s22 }
  0x35   : > { %p790_p7 = pnand %p788_p5, %p748_p13  ;;  %p797_p2 = por %p796_p0, %p795_p12 }
  0x37   : > { %p791_p9 = pneg %p790_p7 }
  0x39   : > { %p798_p1 = pnand %p797_p2, %p791_p9 }
  0x3b   : > { %801 = shalt.err (!%p798_p1)
}
  0x3c   : > { %672 = dma.hbm_to_vmem [thread:$0]  (!%p984_p11), %s1183_s2, 576, %s988_s25, [#allocation6], %s906_s7, %s906_s7, %s907_s8  }
  0x3d   : > { %s1043_s4 = sadd.s32 1, %s902_s15   ;;  %s27_s23 = sadd.s32 1, %s898_s14 }
  0x3e   : > { %s24_s5 = ssub.s32 %s902_s15, %s1043_s4  ;;  %p34_p13 = scmp.ne.s32.totalorder %s898_s14, %s894_s13 }
  0x3f   : > { %p25_p6 = scmp.eq.s32.totalorder %s24_s5, 0  ;;  %p35_p10 = scmp.eq.s32.totalorder %s902_s15, 0 }
  0x40   : > { %p1192_p3 = scmp.eq.s32.totalorder %s954_s16, 1  ;;  %p683_p7 = scmp.lt.s32.totalorder %s902_s15, 2 }
  0x41   : > { %s1059_s9 = scalar_select %p25_p6, %s898_s14, %s27_s23  }
  0x42   : > { %p1053_p5 = por %p1192_p3, %p34_p13  ;;  %p36_p9 = por %p35_p10, %p34_p13 }
  0x43   : > { %s158_s10 = sand.u32 1, %s898_s14   ;;  %s633_s25 = sshll.u32 %s902_s15, 7 }
  0x44   : > { %s1193_s6 = scalar_select %p1053_p5, 1, 0 }
  0x45   : > { %s599_s11 = sshll.u32 %s158_s10, 3  ;;  %s1066_s17 = scalar_lea.hbm %s1181_s0, %s633_s25 }
  0x46   : > { %s162_s21 = scalar_lea.vmem [#allocation2], %s599_s11  ;;  %p1070_p11 = pnand %p683_p7, %p36_p9 }
  0x47   : > { %s170_s24 = sshll.u32 %s162_s21, 4  ;;  %s159_s27 = scalar_lea.sflag [#allocation3], %s158_s10  ;;  %s1068_s24 = int_to_ptr.vmem [resolvable:$true] %s170_s24 }
  0x48   : > { %s802_s28 = scalar_lea.hbm %s1066_s17, 128  ;;  %p804_p0 = pneg %p1070_p11 }
  0x49   : > { %p803_p12 = scmp.ne.s32.totalorder %s1066_s17, %s802_s28  ;;  %s807_s30 = scalar_lea.hbm %s1181_s0, 256 }
  0x4a   : > { %p808_p13 = scmp.lt.u32.totalorder %s1066_s17, %s1181_s0  ;;  %p809_p6 = scmp.lt.u32.totalorder %s807_s30, %s802_s28 }
  0x4b   : > { %p805_p2 = pnand %p804_p0, %p803_p12  ;;  %p811_p3 = scmp.lt.u32.totalorder %s802_s28, %s1066_s17 }
  0x4c   : > { %p810_p10 = por %p809_p6, %p808_p13 }
  0x4d   : > { %p806_p1 = pneg %p805_p2 }
  0x4e   : > { %p812_p7 = por %p811_p3, %p810_p10 }
  0x50   : > { %p813_p9 = pnand %p812_p7, %p806_p1 }
  0x52   : > { %816 = shalt.err (!%p813_p9)
}
  0x53   : > { %s817_s10 = scalar_lea.vmem %s1068_s24, 128  ;;  %s908_s11 = smov [#allocation2]  }
  0x54   : > { %p818_p12 = scmp.ne.s32.totalorder %s1068_s24, %s817_s10  ;;  %s822_s25 = sshll.u32 %s908_s11, 4  ;;  %s823_s25 = int_to_ptr.vmem [resolvable:$false] %s822_s25 }
  0x55   : > { %s824_s7 = scalar_lea.vmem %s823_s25, 256  ;;  %p825_p4 = scmp.lt.s32.totalorder %s1068_s24, %s823_s25 }
  0x56   : > { %p820_p2 = pnand %p818_p12, %p804_p0  ;;  %p826_p13 = scmp.lt.s32.totalorder %s824_s7, %s817_s10 }
  0x58   : > { %p821_p5 = pneg %p820_p2  ;;  %p827_p6 = por %p826_p13, %p825_p4 }
  0x5a   : > { %p828_p10 = pnand %p827_p6, %p821_p5 }
  0x5c   : > { %831 = shalt.err (!%p828_p10)
}
  0x5d   : > { %676 = dma.hbm_to_vmem [thread:$0]  (!%p1070_p11), %s1066_s17, 128, %s1068_s24, %s159_s27  }
  0x5e   : > { %179 = sbr.rel (%p973_p8) target bundleno = 401 (0x191), region = 32  ;;  %s1102_s8 = sand.u32 (!%p973_p8), 1, %s894_s13  }
  0x5f   : > { %s603_s21 = sshll.u32 (!%p973_p8), %s1102_s8, 3  ;;  %s182_s28 = scalar_lea.sflag (!%p973_p8), [#allocation3], %s1102_s8 }
  0x60   : > { %s1106_s22 = scalar_lea.vmem (!%p973_p8), [#allocation2], %s603_s21  ;;  %p1195_p4 = scmp.ne.s32.totalorder (!%p973_p8), %s1188_s18, 0 }
  0x65   : > { %877 = dma.done.wait (%p1195_p4), %s182_s28, 128  }
  0x66   : > { %879 = vsyncadd (%p1195_p4), %s182_s28, 4294967168  ;;  %p1196_p5 = scmp.eq.s32.totalorder %s954_s16, 0 }
  0x68   : > { %881 = dma.done.wait (%p1196_p5), [#allocation6], 2240   ;;  %p1197_p8 = pmov %p1196_p5 }
  0x69   : > { %v909_v0 = vmov 0   ;;  %v910_v1 = vmov 0.0   ;;  %vm911_vm0 = vmmov 0   ;;  %v726_v2 = vld [vmem:[#allocation5] sm:$0xff]   ;;  %v727_v3 = vld [vmem:[#allocation5 + $0x8] sm:$0xff]   ;;  %v728_v4 = vld [vmem:[#allocation5 + $0x10] sm:$0xff]  }
  0x6a   : > { %883 = vsyncadd (%p1197_p8), [#allocation6], 4294965056  ;;  %335 = vmatprep.subr.bf16.mxu0 %v909_v0  ;;  %640 = vmatprep.subr.bf16.mxu1 %v910_v1  ;;  %v734_v5 = vld [vmem:[#allocation7] sm:$0xff]   ;;  %v729_v6 = vld [vmem:[#allocation5 + $0x18] sm:$0xff]   ;;  %vm327_vm1 = vcmask 621568   ;;  %vm428_vm2 = vcmask 1041408  }
  0x6b   : > { %650 = vmatprep.mubr.msk.bf16.mxu1 %vm911_vm0, %v910_v1  ;;  %336 = vmatpush1.bf16.msra.mxu0 %v726_v2  ;;  %v736_v7 = vld [vmem:[#allocation7 + $0x8] sm:$0xff]   ;;  %v730_v8 = vld [vmem:[#allocation5 + $0x20] sm:$0xff]   ;;  %v738_v9 = vld [vmem:[#allocation7 + $0x10] sm:$0xff]   ;;  %vm424_vm3 = vcmask 556032   ;;  %vm331_vm4 = vcmask 1045504   ;;  %s606_s18 = sshll.u32 %s1102_s8, 2 }
  0x6c   : > { %337 = vmatprep.subr.bf16.mxu0 %v909_v0  ;;  %641 = vmatpush3.bf16.msra.mxu1 %v734_v5  ;;  %v217_v10 = vld [vmem:[%s1106_s22] sm:$0xff]  ;;  %v731_v12 = vld [vmem:[#allocation5 + $0x28] sm:$0xff]   ;;  %v740_v13 = vld [vmem:[#allocation7 + $0x18] sm:$0xff]   ;;  %vm485_vm5 = vcmask 1040384   ;;  %s630_s20 = sshll.u32 %s954_s16, 6  ;;  %s215_s17 = scalar_lea.vmem [#allocation8], %s606_s18 }
  0x6d   : > { %642 = vmatprep.subr.bf16.mxu1 %v910_v1  ;;  %v608_v11 = vcombine.high %v217_v10, %v217_v10  ;;  %v742_v14 = vld [vmem:[#allocation7 + $0x20] ss:$0 sps:$4 sm:$0x33]   ;;  %v732_v15 = vld [vmem:[#allocation5 + $0x30] sm:$0xff]   ;;  %v733_v17 = vld [vmem:[#allocation5 + $0x38] sm:$0xff]   ;;  %v607_v24 = vcombine.low %v217_v10, %v217_v10  ;;  %s505_s24 = sshll.u32 %s215_s17, 4  ;;  %s1137_s29 = scalar_lea.hbm %s1184_s3, %s630_s20  ;;  %s1139_s24 = int_to_ptr.vmem [resolvable:$true] %s505_s24 }
  0x6e   : > { %v430_v16 = vsel %vm428_vm2, %v742_v14, 0  ;;  %v735_v18 = vld [vmem:[#allocation5 + $0x40] sm:$0xff]   ;;  %v737_v19 = vld [vmem:[#allocation5 + $0x48] sm:$0xff]   ;;  %v739_v20 = vld [vmem:[#allocation5 + $0x50] sm:$0xff]   ;;  %vm488_vm6 = vcmask 1042432   ;;  %s492_s16 = scalar_lea.sflag [#allocation4], %s1102_s8 }
  0x6f   : > { %338 = vmatpush1.bf16.msra.mxu0 %v727_v3  ;;  %622 = vmatprep.mubr.msk.bf16.mxu0 %vm327_vm1, %v608_v11  ;;  %v741_v21 = vld [vmem:[#allocation5 + $0x58] sm:$0xff]   ;;  %v743_v22 = vld [vmem:[#allocation5 + $0x60] sm:$0x3f]   ;;  %s832_s30 = scalar_lea.vmem %s1139_s24, 64  ;;  %p1198_p0 = scmp.ne.s32.totalorder %s1193_s6, 0 }
  0x70   : > { %339 = vmatprep.subr.bf16.mxu0 %v909_v0  ;;  %643 = vmatpush3.bf16.msra.mxu1 %v736_v7  ;;  %v333_v23 = vsel %vm331_vm4, %v743_v22, 0  ;;  %p833_p11 = scmp.ne.s32.totalorder %s1139_s24, %s832_s30  ;;  %s912_s23 = smov [#allocation8]  }
  0x71   : > { %644 = vmatprep.subr.bf16.mxu1 %v910_v1  ;;  %s836_s5 = sshll.u32 %s912_s23, 4  ;;  %s837_s5 = int_to_ptr.vmem [resolvable:$false] %s836_s5 }
  0x72   : > { %p834_p1 = pnand %p833_p11, %p1198_p0  ;;  %s838_s10 = scalar_lea.vmem %s837_s5, 128 }
  0x73   : > { %340 = vmatpush1.bf16.msra.mxu0 %v728_v4  ;;  %p839_p7 = scmp.lt.s32.totalorder %s1139_s24, %s837_s5  ;;  %p840_p9 = scmp.lt.s32.totalorder %s838_s10, %s832_s30 }
  0x74   : > { %341 = vmatprep.subr.bf16.mxu0 %v909_v0  ;;  %645 = vmatpush3.bf16.msra.mxu1 %v738_v9  ;;  %p835_p3 = pneg %p834_p1 }
  0x75   : > { %646 = vmatprep.subr.bf16.mxu1 %v910_v1  ;;  %p841_p12 = por %p840_p9, %p839_p7 }
  0x77   : > { %342 = vmatpush1.bf16.msra.mxu0 %v729_v6  ;;  %p842_p2 = pnand %p841_p12, %p835_p3 }
  0x78   : > { %343 = vmatprep.subr.bf16.mxu0 %v909_v0  ;;  %647 = vmatpush3.bf16.msra.mxu1 %v740_v13 }
  0x79   : > { %648 = vmatprep.subr.bf16.mxu1 %v910_v1 }
  0x7b   : > { %344 = vmatpush1.bf16.msra.mxu0 %v730_v8 }
  0x7c   : > { %345 = vmatprep.subr.bf16.mxu0 %v909_v0  ;;  %649 = vmatpush3.bf16.msra.mxu1 %v430_v16 }
  0x7f   : > { %346 = vmatpush1.bf16.msra.mxu0 %v731_v12  ;;  %651 = vmatmul.mubr.msk.bf16.vlgmr.msra.gmra.mrb[0].mxu1 %vm424_vm3, %v217_v10 }
  0x80   : > { %347 = vmatprep.subr.bf16.mxu0 %v909_v0 }
  0x83   : > { %348 = vmatpush1.bf16.msra.mxu0 %v732_v15 }
  0x84   : > { %349 = vmatprep.subr.bf16.mxu0 %v909_v0 }
  0x87   : > { %350 = vmatpush1.bf16.msra.mxu0 %v733_v17 }
  0x88   : > { %351 = vmatprep.subr.bf16.mxu0 %v909_v0 }
  0x8b   : > { %352 = vmatpush1.bf16.msra.mxu0 %v735_v18 }
  0x8c   : > { %353 = vmatprep.subr.bf16.mxu0 %v909_v0 }
  0x8f   : > { %354 = vmatpush1.bf16.msra.mxu0 %v737_v19 }
  0x90   : > { %355 = vmatprep.subr.bf16.mxu0 %v909_v0 }
  0x93   : > { %356 = vmatpush1.bf16.msra.mxu0 %v739_v20 }
  0x94   : > { %357 = vmatprep.subr.bf16.mxu0 %v909_v0 }
  0x97   : > { %358 = vmatpush1.bf16.msra.mxu0 %v741_v21 }
  0x98   : > { %359 = vmatprep.subr.bf16.mxu0 %v909_v0 }
  0x9b   : > { %360 = vmatpush1.bf16.msra.mxu0 %v333_v23 }
  0x9e   : > { %368 = vmatmul.mubr.bf16.vlgmr.msra.gmra.mrb[0].mxu0 %v607_v24 }
 0x152   : > { %v466_v25 = vpop.f32.mrb[0].mxu1 }
 0x153   : > { %v652_v26 = vpop.f32.mrb[1].mxu1  ;;  %v478_v29 = vmul.f32 %v466_v25, %v466_v25  ;;  %v472_v30 = vrot.slane %v466_v25, 4 }
 0x154   : > { %v469_v27 = vpop.f32.mrb[2].mxu1 }
 0x155   : > { %v653_v28 = vpop.f32.mrb[3].mxu1  ;;  %v479_v31 = vrot.slane %v478_v29, 4  ;;  %v473_v32 = vadd.f32 %v472_v30, %v466_v25 }
 0x157   : > { %v480_v33 = vadd.f32 %v479_v31, %v478_v29  ;;  %v474_v38 = vrot.slane %v473_v32, 2 }
 0x159   : > { %v481_v40 = vrot.slane %v480_v33, 2  ;;  %v475_v46 = vadd.f32 %v474_v38, %v473_v32 }
 0x15b   : > { %v482_v47 = vadd.f32 %v481_v40, %v480_v33  ;;  %v476_v52 = vrot.slane %v475_v46, 1 }
 0x15d   : > { %v483_v53 = vrot.slane %v482_v47, 1  ;;  %v477_v57 = vadd.f32 %v476_v52, %v475_v46 }
 0x15f   : > { %v484_v58 = vadd.f32 %v483_v53, %v482_v47 }
 0x171   : > { %v369_v34 = vpop.f32.mrb[0].mxu0 }
 0x172   : > { %v375_v35 = vrot.slane %v369_v34, 4  ;;  %v381_v36 = vmul.f32 %v369_v34, %v369_v34  ;;  %v371_v37 = vpop.f32.mrb[1].mxu0 }
 0x173   : > { %v372_v39 = vpop.f32.mrb[2].mxu0 }
 0x174   : > { %v376_v41 = vadd.f32 %v375_v35, %v369_v34  ;;  %v382_v42 = vrot.slane %v381_v36, 4  ;;  %v373_v43 = vpop.f32.mrb[3].mxu0 }
 0x176   : > { %v377_v44 = vrot.slane %v376_v41, 2  ;;  %v383_v45 = vadd.f32 %v382_v42, %v381_v36 }
 0x178   : > { %v378_v48 = vadd.f32 %v377_v44, %v376_v41  ;;  %v384_v49 = vrot.slane %v383_v45, 2 }
 0x17a   : > { %v379_v50 = vrot.slane %v378_v48, 1  ;;  %v385_v51 = vadd.f32 %v384_v49, %v383_v45 }
 0x17c   : > { %v386_v54 = vrot.slane %v385_v51, 1  ;;  %v380_v55 = vadd.f32 %v379_v50, %v378_v48 }
 0x17e   : > { %v387_v56 = vadd.f32 %v386_v54, %v385_v51 }
 0x180   : > { %v486_v59 = vsel %vm485_vm5, %v380_v55, %v387_v56 }
 0x181   : > { %v487_v60 = vsel %vm428_vm2, %v486_v59, %v477_v57 }
 0x182   : > { %v489_v61 = vsel %vm488_vm6, %v487_v60, %v484_v58 }
 0x183   : > { %490 = vst [vmem:[%s215_s17] sm:$0xf] %v489_v61 }
 0x184   : > { %845 = shalt.err (!%p842_p2)
}
 0x185   : > { %s846_s11 = scalar_lea.hbm %s1137_s29, 64  ;;  %s850_s8 = scalar_lea.hbm %s1184_s3, 128 }
 0x186   : > { %p847_p13 = scmp.ne.s32.totalorder %s1137_s29, %s846_s11  ;;  %p851_p4 = scmp.lt.u32.totalorder %s1137_s29, %s1184_s3 }
 0x187   : > { %p852_p5 = scmp.lt.u32.totalorder %s850_s8, %s846_s11  ;;  %p854_p11 = scmp.lt.u32.totalorder %s846_s11, %s1137_s29 }
 0x188   : > { %p848_p6 = pnand %p847_p13, %p1198_p0 }
 0x189   : > { %p853_p8 = por %p852_p5, %p851_p4 }
 0x18a   : > { %p849_p10 = pneg %p848_p6 }
 0x18b   : > { %p855_p1 = por %p854_p11, %p853_p8 }
 0x18d   : > { %p856_p3 = pnand %p855_p1, %p849_p10 }
 0x18f   : > { %859 = shalt.err (!%p856_p3)
}
 0x190   : > { %664 = dma.vmem_to_hbm [thread:$0]  (%p1198_p0), %s1139_s24, 64, %s1137_s29, %s492_s16  }
 0x191 PF: > { %s517_s22 = sand.u32 1, %s890_s12   ;;  %p1199_p7 = scmp.ne.s32.totalorder %s1189_s19, 0 }
 0x192   : > { %p1200_p9 = scmp.ge.s32.totalorder %s902_s15, 2  ;;  %s518_s18 = scalar_lea.sflag [#allocation4], %s517_s22 }
 0x194   : > { %p678_p12 = pnand %p1200_p9, %p1199_p7 }
 0x196   : > { %885 = dma.done.wait (!%p678_p12), %s518_s18, 64  }
 0x197   : > { %887 = vsyncadd (!%p678_p12), %s518_s18, 4294967232  ;;  %p17_p2 = scmp.ge.s32.totalorder %s1043_s4, 4   ;;  %s1201_s12 = smov %s894_s13 }
 0x198   : > { %s1202_s13 = smov %s898_s14  ;;  %s1203_s14 = smov %s1059_s9 }
 0x199   : > { %s1204_s15 = smov %s1043_s4  ;;  %19 = sbr.rel (!%p17_p2) target bundleno = 6 (0x6), region = 85 }
 0x1a0   :  { %523 = vsyncpa [#allocation3], 1 }
 0x1a1   :  { %525 = vsyncpa [#allocation3 + $0x1], 1 }
 0x1a2   :  { %526 = vsyncpa [#allocation6], 1 }
 0x1a3   :  { %527 = vsyncpa [#allocation4], 1 }
 0x1a4   :  { %529 = vsyncpa [#allocation4 + $0x1], 1 }

</bundles_post_ra>
